<compile_context>
chip_gen: v5e
topology: v5e:2x2
jax: 0.10.0
libtpu: 0.0.40
codegen_flags: <defaults>
</compile_context>

<pallas_src>
import functools

import jax
import jax.numpy as jnp
from jax.experimental import pallas as pl
from jax.experimental.pallas import tpu as pltpu


_LN_EPS = 1e-6  # timm ViT LayerNorm eps


# ----------------------------- kernel helpers -----------------------------

def _layernorm(x, g, b, eps=_LN_EPS):
    mu = jnp.mean(x, axis=-1, keepdims=True)
    var = jnp.mean((x - mu) ** 2, axis=-1, keepdims=True)
    return (x - mu) * jax.lax.rsqrt(var + eps) * g + b


def _gelu(x):
    # TODO(synk): timm ViT uses exact erf-GELU; tanh approximation used because
    # erf is not guaranteed to lower in Mosaic.
    return 0.5 * x * (1.0 + jnp.tanh(0.7978845608028654 * (x + 0.044715 * x * x * x)))


# ------------------------------ trunk kernel --------------------------------
# grid = (batch, depth); one transformer block per grid step, activation carried
# in VMEM scratch across the depth axis, per-layer weights streamed per step.

def trunk_kernel(patches_ref, pw_ref, pos_ref,
                 ln1g_ref, ln1b_ref, wqkv_ref, bqkv_ref, wo_ref, bo_ref,
                 ln2g_ref, ln2b_ref, w1_ref, b1_ref, w2_ref, b2_ref,
                 ng_ref, nb_ref,
                 out_ref, x_ref,
                 *, depth, num_heads, seq_len, slots):
    f32 = jnp.float32
    bf16 = jnp.bfloat16
    d = pl.program_id(1)
    s_pad, D = x_ref.shape
    hd = D // num_heads

    # ---- patch embed (+ pre-folded CLS token / patch bias / pos embed) ------
    # Runs only on the first depth step of each image. Row 0 of `patches` is a
    # zero dummy row, so pos_ref row 0 already carries cls + pos[0]; padded rows
    # stay exactly zero.
    @pl.when(d == 0)
    def _():
        emb = jnp.dot(patches_ref[...], pw_ref[...], preferred_element_type=f32)
        x_ref[...] = emb + pos_ref[...].astype(f32)

    x = x_ref[...]

    # ------------------- attention (head-major, transpose-free) --------------
    hln = _layernorm(x, ln1g_ref[...].astype(f32), ln1b_ref[...].astype(f32))
    hb = jnp.broadcast_to(hln.astype(bf16), (num_heads, s_pad, D))
    # w_qkv is pre-permuted host-side to (H, D, 3*hd) with the 1/sqrt(hd) scale
    # folded into the q columns -> qkv comes out head-major, no relayout needed.
    qkv = jnp.einsum('hsd,hdf->hsf', hb, wqkv_ref[...],
                     preferred_element_type=f32) + bqkv_ref[...].astype(f32)
    q = qkv[:, :, :hd].astype(bf16)
    k = qkv[:, :, hd:2 * hd].astype(bf16)
    v = qkv[:, :, 2 * hd:].astype(bf16)

    s = jnp.einsum('hqd,hkd->hqk', q, k, preferred_element_type=f32)
    if seq_len < s_pad:  # mask padded key columns so they don't pollute softmax
        kidx = jax.lax.broadcasted_iota(jnp.int32, (num_heads, s_pad, s_pad), 2)
        s = jnp.where(kidx < seq_len, s, -1e30)
    s = s - jnp.max(s, axis=-1, keepdims=True)
    p = jnp.exp(s)
    p = p * pl.reciprocal(jnp.sum(p, axis=-1, keepdims=True), approx=True)
    o = jnp.einsum('hqk,hkd->hqd', p.astype(bf16), v, preferred_element_type=f32)

    # output projection: batched per-head matmul + reduce over heads (same flops
    # as the fused (S,D)x(D,D) matmul, avoids the (H,S,hd)->(S,D) relayout).
    attn = jnp.einsum('hsf,hfe->hse', o.astype(bf16), wo_ref[...],
                      preferred_element_type=f32)
    attn = jnp.sum(attn, axis=0) + bo_ref[...].astype(f32)
    x = x + attn

    # --------------------------------- MLP -----------------------------------
    h2 = _layernorm(x, ln2g_ref[...].astype(f32), ln2b_ref[...].astype(f32))
    m = jnp.dot(h2.astype(bf16), w1_ref[...], preferred_element_type=f32)
    m = _gelu(m + b1_ref[...].astype(f32))
    m = jnp.dot(m.astype(bf16), w2_ref[...], preferred_element_type=f32)
    x = x + m + b2_ref[...].astype(f32)

    x_ref[...] = x

    # -------- write only the hidden states feature_select actually needs -----
    # One concatenated lane-contiguous output; slot j <- layer slots[j].
    for j, layer_idx in enumerate(slots):
        lo, hi = j * D, (j + 1) * D
        if layer_idx < depth:
            @pl.when(d == layer_idx)
            def _(lo=lo, hi=hi):
                out_ref[:, lo:hi] = x.astype(out_ref.dtype)
        else:  # hidden_states[-1] == trunk.norm(last block output)
            @pl.when(d == depth - 1)
            def _(lo=lo, hi=hi):
                xn = _layernorm(x, ng_ref[...].astype(f32), nb_ref[...].astype(f32))
                out_ref[:, lo:hi] = xn.astype(out_ref.dtype)


# ------------------------------ pallas wrapper -------------------------------

def run_fused_trunk(patches, params, *, depth, num_heads, seq_len, slots, out_dtype):
    B, s_pad, K = patches.shape
    D = params["patch_w"].shape[-1]
    n_slots = len(slots)

    const_names = ("patch_w", "pos_fold")
    layer_names = ("ln1_g", "ln1_b", "w_qkv", "b_qkv", "wo", "bo",
                   "ln2_g", "ln2_b", "w1", "b1", "w2", "b2")
    tail_names = ("norm_g", "norm_b")

    def const_spec(a):
        r = a.ndim
        return pl.BlockSpec(a.shape, lambda b, d, r=r: (0,) * r)

    def layer_spec(a):
        r = a.ndim
        return pl.BlockSpec((None,) + a.shape[1:],
                            lambda b, d, r=r: (d,) + (0,) * (r - 1))

    weights = []
    in_specs = [pl.BlockSpec((None, s_pad, K), lambda b, d: (b, 0, 0))]
    for n in const_names:
        weights.append(params[n]); in_specs.append(const_spec(params[n]))
    for n in layer_names:  # streamed per depth step -> auto double-buffered
        weights.append(params[n]); in_specs.append(layer_spec(params[n]))
    for n in tail_names:
        weights.append(params[n]); in_specs.append(const_spec(params[n]))

    kernel = functools.partial(trunk_kernel, depth=depth, num_heads=num_heads,
                               seq_len=seq_len, slots=tuple(slots))
    # TODO(synk): at production ViT-B sizes set vmem_limit_bytes explicitly and
    # consider pipeline_mode=pl.Buffered(3) on the per-layer weight specs (v5e).
    return pl.pallas_call(
        kernel,
        grid=(B, depth),
        out_shape=jax.ShapeDtypeStruct((B, s_pad, n_slots * D), out_dtype),
        in_specs=in_specs,
        out_specs=pl.BlockSpec((None, s_pad, n_slots * D), lambda b, d: (b, 0, 0)),
        scratch_shapes=[pltpu.VMEM((s_pad, D), jnp.float32)],
        compiler_params=pltpu.CompilerParams(
            dimension_semantics=("parallel", "arbitrary")),
    )(patches, *weights)


# --------------------------- BMClipVisionTower (JAX) -------------------------

class BMClipVisionTowerPallas:
    """JAX/Pallas re-implementation of BMClipVisionTower.forward semantics."""

    def __init__(self, *, image_size=16, patch_size=8, in_chans=3, hidden=32,
                 num_heads=4, depth=3, mlp_ratio=4,
                 select_layer=-2, select_feature="patch", seed=0):
        self.image_size = image_size
        self.patch_size = patch_size
        self.in_chans = in_chans
        self.hidden = hidden
        self.num_heads = num_heads
        self.depth = depth
        self.mlp = hidden * mlp_ratio
        self.select_layer = select_layer
        self.select_feature = select_feature
        self.num_patches_per_side = image_size // patch_size
        self.num_patches = self.num_patches_per_side ** 2
        self.seq_len = self.num_patches + 1                     # patches + CLS
        self.seq_pad = ((self.seq_len + 7) // 8) * 8            # sublane-friendly
        self._init_params(seed)

    def _init_params(self, seed):
        dt = jnp.bfloat16  # mirrors precision='bf16' in load_model
        D, C, ps, Hm, H = self.hidden, self.in_chans, self.patch_size, self.mlp, self.num_heads
        hd = D // H
        S, S_pad = self.seq_len, self.seq_pad
        scale = 1.0 / float(hd) ** 0.5
        keys = iter(jax.random.split(jax.random.PRNGKey(seed), 4 + 12 * self.depth))

        def nrm(k, shape, s=0.02):
            return s * jax.random.normal(k, shape, jnp.float32)

        conv_w = nrm(next(keys), (D, C, ps, ps))                 # PyTorch conv layout
        patch_w = conv_w.reshape(D, C * ps * ps).T               # (C*ps*ps, D)
        patch_b = nrm(next(keys), (1, D))
        cls = nrm(next(keys), (1, D))
        pos = nrm(next(keys), (S, D))

        # Fold CLS token + patch bias into the position table (kernel does a
        # single add): row 0 <- pos[0] + cls (its patch row is all-zero), rows
        # 1..S-1 <- pos + patch_b, padded rows stay zero.
        pos_fold = jnp.zeros((S_pad, D), jnp.float32)
        pos_fold = pos_fold.at[1:S].set(pos[1:] + patch_b)
        pos_fold = pos_fold.at[0].set(pos[0] + cls[0])

        p = dict(patch_w=patch_w.astype(dt), pos_fold=pos_fold.astype(dt),
                 norm_g=jnp.ones((1, D), dt), norm_b=jnp.zeros((1, D), dt))

        per = {n: [] for n in ("ln1_g", "ln1_b", "w_qkv", "b_qkv", "wo", "bo",
                               "ln2_g", "ln2_b", "w1", "b1", "w2", "b2")}
        for _ in range(self.depth):
            wq = nrm(next(keys), (D, D)) * scale                 # scale folded into q
            wk = nrm(next(keys), (D, D))
            wv = nrm(next(keys), (D, D))
            bq = nrm(next(keys), (1, D)) * scale
            bk = nrm(next(keys), (1, D))
            bv = nrm(next(keys), (1, D))
            # head-major qkv weights: (H, D, 3*hd)
            w_qkv_h = jnp.stack([jnp.concatenate(
                [wq[:, h * hd:(h + 1) * hd], wk[:, h * hd:(h + 1) * hd],
                 wv[:, h * hd:(h + 1) * hd]], axis=1) for h in range(H)], axis=0)
            b_qkv_h = jnp.stack([jnp.concatenate(
                [bq[:, h * hd:(h + 1) * hd], bk[:, h * hd:(h + 1) * hd],
                 bv[:, h * hd:(h + 1) * hd]], axis=1) for h in range(H)], axis=0)
            wo = nrm(next(keys), (D, D))
            wo_h = jnp.stack([wo[h * hd:(h + 1) * hd, :] for h in range(H)], axis=0)

            per["ln1_g"].append(jnp.ones((1, D)))
            per["ln1_b"].append(jnp.zeros((1, D)))
            per["w_qkv"].append(w_qkv_h)
            per["b_qkv"].append(b_qkv_h)
            per["wo"].append(wo_h)
            per["bo"].append(nrm(next(keys), (1, D)))
            per["ln2_g"].append(jnp.ones((1, D)))
            per["ln2_b"].append(jnp.zeros((1, D)))
            per["w1"].append(nrm(next(keys), (D, Hm)))
            per["b1"].append(nrm(next(keys), (1, Hm)))
            per["w2"].append(nrm(next(keys), (Hm, D)))
            per["b2"].append(nrm(next(keys), (1, D)))
        for n, lst in per.items():
            p[n] = jnp.stack(lst, axis=0).astype(dt)             # (depth, ...)
        self.params = p

    # Ordered layer indices that feature_select reads (torch.cat order).
    def _slot_layers(self):
        L = self.depth + 1
        if self.select_feature in ("slicefour_patch", "slicefour_cls_patch"):
            k = L // 4
            idxs = list(range(k + self.select_layer, L, k))
        elif self.select_feature in ("slice_m25811_f6_patch", "slice_m25811_f6_cls_patch"):
            idxs = [-2, -5, -8, -11, 6]
        else:
            idxs = [self.select_layer]
        return [i % L for i in idxs]

    def _patchify(self, images):
        B, C, Hi, Wi = images.shape
        ps = self.patch_size
        nh, nw = Hi // ps, Wi // ps
        # TODO(synk): at production 224x224 this NCHW->patch flattening should be
        # folded into the kernel input path (index_map / pre-laid-out weights)
        # instead of a standalone XLA transpose that round-trips HBM.
        x = images.reshape(B, C, nh, ps, nw, ps)
        x = x.transpose(0, 2, 4, 1, 3, 5).reshape(B, nh * nw, C * ps * ps)
        x = x.astype(jnp.bfloat16)
        K = x.shape[-1]
        # row 0 = CLS slot (zero; cls/pos/bias folded into pos table), tail = pad.
        return jnp.concatenate(
            [jnp.zeros((B, 1, K), jnp.bfloat16), x,
             jnp.zeros((B, self.seq_pad - self.seq_len, K), jnp.bfloat16)], axis=1)

    def _forward_batch(self, images):
        patches = self._patchify(images)
        slots = self._slot_layers()
        out = run_fused_trunk(patches, self.params, depth=self.depth,
                              num_heads=self.num_heads, seq_len=self.seq_len,
                              slots=tuple(slots), out_dtype=images.dtype)
        # feature_select: the kernel already emitted the needed hidden states
        # concatenated along the last dim in feature_select order.
        base = self.select_feature
        for pref in ("slicefour_", "slice_m25811_f6_"):
            base = base.replace(pref, "")
        if base == "patch":
            return out[:, 1:self.seq_len]
        elif base == "cls_patch":
            return out[:, :self.seq_len]
        raise ValueError(f"Unexpected select feature: {self.select_feature}")

    def __call__(self, images):
        if isinstance(images, list):
            # Batch the list into one pallas_call instead of one call per image.
            batch = jnp.stack([jnp.asarray(im) for im in images], axis=0)
            feats = self._forward_batch(batch)
            return [feats[i:i + 1].astype(images[i].dtype) for i in range(len(images))]
        return self._forward_batch(images).astype(images.dtype)


# ----------------------------------- main ------------------------------------

if __name__ == "__main__":
    tower = BMClipVisionTowerPallas(image_size=16, patch_size=8, in_chans=3,
                                    hidden=32, num_heads=4, depth=3,
                                    select_layer=-2, select_feature="patch", seed=0)
    key = jax.random.PRNGKey(0)
    images = jax.random.normal(key, (2, 3, 16, 16), jnp.float32)  # NCHW

    feats = tower(images)
    feats = jax.block_until_ready(feats)

    assert feats.shape == (2, tower.num_patches, tower.hidden), feats.shape
    assert feats.dtype == images.dtype, feats.dtype
    print("KERNEL_OK")
</pallas_src>

<mosaic_0001>
module attributes {stable_mosaic.version = 11 : i64} {
  func.func @trunk_kernel(%arg0: i32, %arg1: i32, %arg2: memref<1x8x192xbf16, #tpu.memory_space<vmem>>, %arg3: memref<192x32xbf16, #tpu.memory_space<vmem>>, %arg4: memref<8x32xbf16, #tpu.memory_space<vmem>>, %arg5: memref<1x1x32xbf16, #tpu.memory_space<vmem>>, %arg6: memref<1x1x32xbf16, #tpu.memory_space<vmem>>, %arg7: memref<1x4x32x24xbf16, #tpu.memory_space<vmem>>, %arg8: memref<1x4x1x24xbf16, #tpu.memory_space<vmem>>, %arg9: memref<1x4x8x32xbf16, #tpu.memory_space<vmem>>, %arg10: memref<1x1x32xbf16, #tpu.memory_space<vmem>>, %arg11: memref<1x1x32xbf16, #tpu.memory_space<vmem>>, %arg12: memref<1x1x32xbf16, #tpu.memory_space<vmem>>, %arg13: memref<1x32x128xbf16, #tpu.memory_space<vmem>>, %arg14: memref<1x1x128xbf16, #tpu.memory_space<vmem>>, %arg15: memref<1x128x32xbf16, #tpu.memory_space<vmem>>, %arg16: memref<1x1x32xbf16, #tpu.memory_space<vmem>>, %arg17: memref<1x32xbf16, #tpu.memory_space<vmem>>, %arg18: memref<1x32xbf16, #tpu.memory_space<vmem>>, %arg19: memref<1x8x32xf32, #tpu.memory_space<vmem>>, %arg20: memref<8x32xf32, #tpu.memory_space<vmem>>) attributes {dimension_semantics = [#tpu.dimension_semantics<parallel>, #tpu.dimension_semantics<arbitrary>], iteration_bounds = array<i64: 2, 3>, scalar_prefetch = 0 : i64, scratch_operands = 1 : i64, tpu.core_type = #tpu.core_type<tc>, window_params = [{transform_indices = @transform_0, window_bounds = array<i64: 1, 8, 192>}, {pipeline_mode = #tpu.pipeline_mode<synchronous>, transform_indices = @transform_1, window_bounds = array<i64: 192, 32>}, {pipeline_mode = #tpu.pipeline_mode<synchronous>, transform_indices = @transform_2, window_bounds = array<i64: 8, 32>}, {transform_indices = @transform_3, window_bounds = array<i64: 1, 1, 32>}, {transform_indices = @transform_4, window_bounds = array<i64: 1, 1, 32>}, {transform_indices = @transform_5, window_bounds = array<i64: 1, 4, 32, 24>}, {transform_indices = @transform_6, window_bounds = array<i64: 1, 4, 1, 24>}, {transform_indices = @transform_7, window_bounds = array<i64: 1, 4, 8, 32>}, {transform_indices = @transform_8, window_bounds = array<i64: 1, 1, 32>}, {transform_indices = @transform_9, window_bounds = array<i64: 1, 1, 32>}, {transform_indices = @transform_10, window_bounds = array<i64: 1, 1, 32>}, {transform_indices = @transform_11, window_bounds = array<i64: 1, 32, 128>}, {transform_indices = @transform_12, window_bounds = array<i64: 1, 1, 128>}, {transform_indices = @transform_13, window_bounds = array<i64: 1, 128, 32>}, {transform_indices = @transform_14, window_bounds = array<i64: 1, 1, 32>}, {pipeline_mode = #tpu.pipeline_mode<synchronous>, transform_indices = @transform_15, window_bounds = array<i64: 1, 32>}, {pipeline_mode = #tpu.pipeline_mode<synchronous>, transform_indices = @transform_16, window_bounds = array<i64: 1, 32>}, {transform_indices = @transform_17, window_bounds = array<i64: 1, 8, 32>}]} {
    %c0_i32 = arith.constant 0 : i32
    %0 = arith.cmpi eq, %arg1, %c0_i32 : i32
    %1 = arith.extui %0 : i1 to i32
    %c0_i32_0 = arith.constant 0 : i32
    %2 = arith.cmpi ne, %1, %c0_i32_0 : i32
    scf.if %2 {
      %c0_67 = arith.constant 0 : index
      %c0_68 = arith.constant 0 : index
      %c0_69 = arith.constant 0 : index
      %142 = vector.load %arg2[%c0_67, %c0_68, %c0_69] : memref<1x8x192xbf16, #tpu.memory_space<vmem>>, vector<1x8x192xbf16>
      %143 = vector.shape_cast %142 : vector<1x8x192xbf16> to vector<8x192xbf16>
      %c0_70 = arith.constant 0 : index
      %c0_71 = arith.constant 0 : index
      %144 = vector.load %arg3[%c0_70, %c0_71] : memref<192x32xbf16, #tpu.memory_space<vmem>>, vector<192x32xbf16>
      %cst_72 = arith.constant dense<0.000000e+00> : vector<8x32xf32>
      %145 = tpu.matmul %143, %144, %cst_72 {dimension_numbers = #tpu.dot_dimension_numbers<[1], [0], [0], [1], [0, 0, 1, 1], [], []>} : vector<8x192xbf16>, vector<192x32xbf16>, vector<8x32xf32> -> vector<8x32xf32>
      %c0_73 = arith.constant 0 : index
      %c0_74 = arith.constant 0 : index
      %146 = vector.load %arg4[%c0_73, %c0_74] : memref<8x32xbf16, #tpu.memory_space<vmem>>, vector<8x32xbf16>
      %147 = arith.extf %146 : vector<8x32xbf16> to vector<8x32xf32>
      %148 = arith.addf %145, %147 : vector<8x32xf32>
      %c0_75 = arith.constant 0 : index
      %c0_76 = arith.constant 0 : index
      %149 = vector.load %arg20[%c0_75, %c0_76] : memref<8x32xf32, #tpu.memory_space<vmem>>, vector<8x32xf32>
      tpu.vector_store %arg20[%c0_75, %c0_76], %148 {strides = array<i32>} : memref<8x32xf32, #tpu.memory_space<vmem>>, vector<8x32xf32>,
    } else {
    }
    %c0 = arith.constant 0 : index
    %c0_1 = arith.constant 0 : index
    %3 = vector.load %arg20[%c0, %c0_1] : memref<8x32xf32, #tpu.memory_space<vmem>>, vector<8x32xf32>
    %c0_2 = arith.constant 0 : index
    %c0_3 = arith.constant 0 : index
    %c0_4 = arith.constant 0 : index
    %4 = vector.load %arg5[%c0_2, %c0_3, %c0_4] : memref<1x1x32xbf16, #tpu.memory_space<vmem>>, vector<1x1x32xbf16>
    %5 = vector.shape_cast %4 : vector<1x1x32xbf16> to vector<1x32xbf16>
    %6 = arith.extf %5 : vector<1x32xbf16> to vector<1x32xf32>
    %c0_5 = arith.constant 0 : index
    %c0_6 = arith.constant 0 : index
    %c0_7 = arith.constant 0 : index
    %7 = vector.load %arg6[%c0_5, %c0_6, %c0_7] : memref<1x1x32xbf16, #tpu.memory_space<vmem>>, vector<1x1x32xbf16>
    %8 = vector.shape_cast %7 : vector<1x1x32xbf16> to vector<1x32xbf16>
    %9 = arith.extf %8 : vector<1x32xbf16> to vector<1x32xf32>
    %cst = arith.constant dense<0.000000e+00> : vector<8xf32>
    %10 = vector.multi_reduction <add>, %3, %cst [1] : vector<8x32xf32> to vector<8xf32>
    %11 = vector.shape_cast %10 : vector<8xf32> to vector<8x1xf32>
    %cst_8 = arith.constant 3.200000e+01 : f32
    %12 = vector.broadcast %cst_8 : f32 to vector<8x1xf32>
    %13 = arith.divf %11, %12 : vector<8x1xf32>
    %14 = vector.broadcast %13 : vector<8x1xf32> to vector<8x32xf32>
    %15 = arith.subf %3, %14 : vector<8x32xf32>
    %16 = arith.mulf %15, %15 : vector<8x32xf32>
    %cst_9 = arith.constant dense<0.000000e+00> : vector<8xf32>
    %17 = vector.multi_reduction <add>, %16, %cst_9 [1] : vector<8x32xf32> to vector<8xf32>
    %18 = vector.shape_cast %17 : vector<8xf32> to vector<8x1xf32>
    %cst_10 = arith.constant 3.200000e+01 : f32
    %19 = vector.broadcast %cst_10 : f32 to vector<8x1xf32>
    %20 = arith.divf %18, %19 : vector<8x1xf32>
    %21 = vector.broadcast %13 : vector<8x1xf32> to vector<8x32xf32>
    %22 = arith.subf %3, %21 : vector<8x32xf32>
    %cst_11 = arith.constant 9.99999997E-7 : f32
    %23 = vector.broadcast %cst_11 : f32 to vector<8x1xf32>
    %24 = arith.addf %20, %23 : vector<8x1xf32>
    %25 = math.rsqrt %24 : vector<8x1xf32>
    %26 = vector.broadcast %25 : vector<8x1xf32> to vector<8x32xf32>
    %27 = arith.mulf %22, %26 : vector<8x32xf32>
    %28 = vector.broadcast %6 : vector<1x32xf32> to vector<8x32xf32>
    %29 = arith.mulf %27, %28 : vector<8x32xf32>
    %30 = vector.broadcast %9 : vector<1x32xf32> to vector<8x32xf32>
    %31 = arith.addf %29, %30 : vector<8x32xf32>
    %32 = arith.truncf %31 : vector<8x32xf32> to vector<8x32xbf16>
    %33 = vector.shape_cast %32 : vector<8x32xbf16> to vector<1x8x32xbf16>
    %34 = vector.broadcast %33 : vector<1x8x32xbf16> to vector<4x8x32xbf16>
    %c0_12 = arith.constant 0 : index
    %c0_13 = arith.constant 0 : index
    %c0_14 = arith.constant 0 : index
    %c0_15 = arith.constant 0 : index
    %35 = vector.load %arg7[%c0_12, %c0_13, %c0_14, %c0_15] : memref<1x4x32x24xbf16, #tpu.memory_space<vmem>>, vector<1x4x32x24xbf16>
    %36 = vector.shape_cast %35 : vector<1x4x32x24xbf16> to vector<4x32x24xbf16>
    "tpu.trace_start"() <{level = 10 : i32, message = "hsd,hdf->hsf"}> : () -> ()
    %cst_16 = arith.constant dense<0.000000e+00> : vector<4x8x24xf32>
    %37 = tpu.matmul %34, %36, %cst_16 {dimension_numbers = #tpu.dot_dimension_numbers<[2], [1], [1], [2], [0, 0, 0, 1, 1, 2], [0], [0]>} : vector<4x8x32xbf16>, vector<4x32x24xbf16>, vector<4x8x24xf32> -> vector<4x8x24xf32>
    "tpu.trace_stop"() : () -> ()
    %c0_17 = arith.constant 0 : index
    %c0_18 = arith.constant 0 : index
    %c0_19 = arith.constant 0 : index
    %c0_20 = arith.constant 0 : index
    %38 = vector.load %arg8[%c0_17, %c0_18, %c0_19, %c0_20] : memref<1x4x1x24xbf16, #tpu.memory_space<vmem>>, vector<1x4x1x24xbf16>
    %39 = vector.shape_cast %38 : vector<1x4x1x24xbf16> to vector<4x1x24xbf16>
    %40 = arith.extf %39 : vector<4x1x24xbf16> to vector<4x1x24xf32>
    %41 = vector.broadcast %40 : vector<4x1x24xf32> to vector<4x8x24xf32>
    %42 = arith.addf %37, %41 : vector<4x8x24xf32>
    %43 = vector.extract_strided_slice %42 {offsets = [0, 0, 0], sizes = [4, 8, 8], strides = [1, 1, 1]} : vector<4x8x24xf32> to vector<4x8x8xf32>
    %44 = arith.truncf %43 : vector<4x8x8xf32> to vector<4x8x8xbf16>
    %45 = vector.extract_strided_slice %42 {offsets = [0, 0, 8], sizes = [4, 8, 8], strides = [1, 1, 1]} : vector<4x8x24xf32> to vector<4x8x8xf32>
    %46 = arith.truncf %45 : vector<4x8x8xf32> to vector<4x8x8xbf16>
    %47 = vector.extract_strided_slice %42 {offsets = [0, 0, 16], sizes = [4, 8, 8], strides = [1, 1, 1]} : vector<4x8x24xf32> to vector<4x8x8xf32>
    %48 = arith.truncf %47 : vector<4x8x8xf32> to vector<4x8x8xbf16>
    "tpu.trace_start"() <{level = 10 : i32, message = "hqd,hkd->hqk"}> : () -> ()
    %cst_21 = arith.constant dense<0.000000e+00> : vector<4x8x8xf32>
    %49 = tpu.matmul %44, %46, %cst_21 {dimension_numbers = #tpu.dot_dimension_numbers<[2], [2], [1], [1], [0, 0, 0, 1, 1, 1], [0], [0]>} : vector<4x8x8xbf16>, vector<4x8x8xbf16>, vector<4x8x8xf32> -> vector<4x8x8xf32>
    "tpu.trace_stop"() : () -> ()
    %50 = tpu.iota {dimensions = array<i32: 2>} : vector<4x8x8xi32>
    %c5_i32 = arith.constant 5 : i32
    %51 = vector.broadcast %c5_i32 : i32 to vector<4x8x8xi32>
    %52 = arith.cmpi slt, %50, %51 : vector<4x8x8xi32>
    %cst_22 = arith.constant -1.000000e+30 : f32
    %53 = vector.broadcast %cst_22 : f32 to vector<4x8x8xf32>
    %54 = arith.select %52, %49, %53 : vector<4x8x8xi1>, vector<4x8x8xf32>
    %cst_23 = arith.constant dense<0xFF800000> : vector<4x8xf32>
    %55 = vector.multi_reduction <maximumf>, %54, %cst_23 [2] : vector<4x8x8xf32> to vector<4x8xf32>
    %56 = vector.shape_cast %55 : vector<4x8xf32> to vector<4x8x1xf32>
    %57 = vector.broadcast %56 : vector<4x8x1xf32> to vector<4x8x8xf32>
    %58 = arith.subf %54, %57 : vector<4x8x8xf32>
    %59 = math.exp %58 : vector<4x8x8xf32>
    %cst_24 = arith.constant dense<0.000000e+00> : vector<4x8xf32>
    %60 = vector.multi_reduction <add>, %59, %cst_24 [2] : vector<4x8x8xf32> to vector<4x8xf32>
    %61 = vector.shape_cast %60 : vector<4x8xf32> to vector<4x8x1xf32>
    %62 = tpu.reciprocal %61 {approx = true} : vector<4x8x1xf32> -> vector<4x8x1xf32>
    %63 = vector.broadcast %62 : vector<4x8x1xf32> to vector<4x8x8xf32>
    %64 = arith.mulf %59, %63 : vector<4x8x8xf32>
    %65 = arith.truncf %64 : vector<4x8x8xf32> to vector<4x8x8xbf16>
    "tpu.trace_start"() <{level = 10 : i32, message = "hqk,hkd->hqd"}> : () -> ()
    %cst_25 = arith.constant dense<0.000000e+00> : vector<4x8x8xf32>
    %66 = tpu.matmul %65, %48, %cst_25 {dimension_numbers = #tpu.dot_dimension_numbers<[2], [1], [1], [2], [0, 0, 0, 1, 1, 2], [0], [0]>} : vector<4x8x8xbf16>, vector<4x8x8xbf16>, vector<4x8x8xf32> -> vector<4x8x8xf32>
    "tpu.trace_stop"() : () -> ()
    %67 = arith.truncf %66 : vector<4x8x8xf32> to vector<4x8x8xbf16>
    %c0_26 = arith.constant 0 : index
    %c0_27 = arith.constant 0 : index
    %c0_28 = arith.constant 0 : index
    %c0_29 = arith.constant 0 : index
    %68 = vector.load %arg9[%c0_26, %c0_27, %c0_28, %c0_29] : memref<1x4x8x32xbf16, #tpu.memory_space<vmem>>, vector<1x4x8x32xbf16>
    %69 = vector.shape_cast %68 : vector<1x4x8x32xbf16> to vector<4x8x32xbf16>
    "tpu.trace_start"() <{level = 10 : i32, message = "hsf,hfe->hse"}> : () -> ()
    %cst_30 = arith.constant dense<0.000000e+00> : vector<4x8x32xf32>
    %70 = tpu.matmul %67, %69, %cst_30 {dimension_numbers = #tpu.dot_dimension_numbers<[2], [1], [1], [2], [0, 0, 0, 1, 1, 2], [0], [0]>} : vector<4x8x8xbf16>, vector<4x8x32xbf16>, vector<4x8x32xf32> -> vector<4x8x32xf32>
    "tpu.trace_stop"() : () -> ()
    %cst_31 = arith.constant dense<0.000000e+00> : vector<8x32xf32>
    %71 = vector.multi_reduction <add>, %70, %cst_31 [0] : vector<4x8x32xf32> to vector<8x32xf32>
    %c0_32 = arith.constant 0 : index
    %c0_33 = arith.constant 0 : index
    %c0_34 = arith.constant 0 : index
    %72 = vector.load %arg10[%c0_32, %c0_33, %c0_34] : memref<1x1x32xbf16, #tpu.memory_space<vmem>>, vector<1x1x32xbf16>
    %73 = vector.shape_cast %72 : vector<1x1x32xbf16> to vector<1x32xbf16>
    %74 = arith.extf %73 : vector<1x32xbf16> to vector<1x32xf32>
    %75 = vector.broadcast %74 : vector<1x32xf32> to vector<8x32xf32>
    %76 = arith.addf %71, %75 : vector<8x32xf32>
    %77 = arith.addf %3, %76 : vector<8x32xf32>
    %c0_35 = arith.constant 0 : index
    %c0_36 = arith.constant 0 : index
    %c0_37 = arith.constant 0 : index
    %78 = vector.load %arg11[%c0_35, %c0_36, %c0_37] : memref<1x1x32xbf16, #tpu.memory_space<vmem>>, vector<1x1x32xbf16>
    %79 = vector.shape_cast %78 : vector<1x1x32xbf16> to vector<1x32xbf16>
    %80 = arith.extf %79 : vector<1x32xbf16> to vector<1x32xf32>
    %c0_38 = arith.constant 0 : index
    %c0_39 = arith.constant 0 : index
    %c0_40 = arith.constant 0 : index
    %81 = vector.load %arg12[%c0_38, %c0_39, %c0_40] : memref<1x1x32xbf16, #tpu.memory_space<vmem>>, vector<1x1x32xbf16>
    %82 = vector.shape_cast %81 : vector<1x1x32xbf16> to vector<1x32xbf16>
    %83 = arith.extf %82 : vector<1x32xbf16> to vector<1x32xf32>
    %cst_41 = arith.constant dense<0.000000e+00> : vector<8xf32>
    %84 = vector.multi_reduction <add>, %77, %cst_41 [1] : vector<8x32xf32> to vector<8xf32>
    %85 = vector.shape_cast %84 : vector<8xf32> to vector<8x1xf32>
    %cst_42 = arith.constant 3.200000e+01 : f32
    %86 = vector.broadcast %cst_42 : f32 to vector<8x1xf32>
    %87 = arith.divf %85, %86 : vector<8x1xf32>
    %88 = vector.broadcast %87 : vector<8x1xf32> to vector<8x32xf32>
    %89 = arith.subf %77, %88 : vector<8x32xf32>
    %90 = arith.mulf %89, %89 : vector<8x32xf32>
    %cst_43 = arith.constant dense<0.000000e+00> : vector<8xf32>
    %91 = vector.multi_reduction <add>, %90, %cst_43 [1] : vector<8x32xf32> to vector<8xf32>
    %92 = vector.shape_cast %91 : vector<8xf32> to vector<8x1xf32>
    %cst_44 = arith.constant 3.200000e+01 : f32
    %93 = vector.broadcast %cst_44 : f32 to vector<8x1xf32>
    %94 = arith.divf %92, %93 : vector<8x1xf32>
    %95 = vector.broadcast %87 : vector<8x1xf32> to vector<8x32xf32>
    %96 = arith.subf %77, %95 : vector<8x32xf32>
    %cst_45 = arith.constant 9.99999997E-7 : f32
    %97 = vector.broadcast %cst_45 : f32 to vector<8x1xf32>
    %98 = arith.addf %94, %97 : vector<8x1xf32>
    %99 = math.rsqrt %98 : vector<8x1xf32>
    %100 = vector.broadcast %99 : vector<8x1xf32> to vector<8x32xf32>
    %101 = arith.mulf %96, %100 : vector<8x32xf32>
    %102 = vector.broadcast %80 : vector<1x32xf32> to vector<8x32xf32>
    %103 = arith.mulf %101, %102 : vector<8x32xf32>
    %104 = vector.broadcast %83 : vector<1x32xf32> to vector<8x32xf32>
    %105 = arith.addf %103, %104 : vector<8x32xf32>
    %106 = arith.truncf %105 : vector<8x32xf32> to vector<8x32xbf16>
    %c0_46 = arith.constant 0 : index
    %c0_47 = arith.constant 0 : index
    %c0_48 = arith.constant 0 : index
    %107 = vector.load %arg13[%c0_46, %c0_47, %c0_48] : memref<1x32x128xbf16, #tpu.memory_space<vmem>>, vector<1x32x128xbf16>
    %108 = vector.shape_cast %107 : vector<1x32x128xbf16> to vector<32x128xbf16>
    %cst_49 = arith.constant dense<0.000000e+00> : vector<8x128xf32>
    %109 = tpu.matmul %106, %108, %cst_49 {dimension_numbers = #tpu.dot_dimension_numbers<[1], [0], [0], [1], [0, 0, 1, 1], [], []>} : vector<8x32xbf16>, vector<32x128xbf16>, vector<8x128xf32> -> vector<8x128xf32>
    %c0_50 = arith.constant 0 : index
    %c0_51 = arith.constant 0 : index
    %c0_52 = arith.constant 0 : index
    %110 = vector.load %arg14[%c0_50, %c0_51, %c0_52] : memref<1x1x128xbf16, #tpu.memory_space<vmem>>, vector<1x1x128xbf16>
    %111 = vector.shape_cast %110 : vector<1x1x128xbf16> to vector<1x128xbf16>
    %112 = arith.extf %111 : vector<1x128xbf16> to vector<1x128xf32>
    %113 = vector.broadcast %112 : vector<1x128xf32> to vector<8x128xf32>
    %114 = arith.addf %109, %113 : vector<8x128xf32>
    %cst_53 = arith.constant 5.000000e-01 : f32
    %115 = vector.broadcast %cst_53 : f32 to vector<8x128xf32>
    %116 = arith.mulf %115, %114 : vector<8x128xf32>
    %cst_54 = arith.constant 4.471500e-02 : f32
    %117 = vector.broadcast %cst_54 : f32 to vector<8x128xf32>
    %118 = arith.mulf %117, %114 : vector<8x128xf32>
    %119 = arith.mulf %118, %114 : vector<8x128xf32>
    %120 = arith.mulf %119, %114 : vector<8x128xf32>
    %121 = arith.addf %114, %120 : vector<8x128xf32>
    %cst_55 = arith.constant 0.797884583 : f32
    %122 = vector.broadcast %cst_55 : f32 to vector<8x128xf32>
    %123 = arith.mulf %122, %121 : vector<8x128xf32>
    %124 = math.tanh %123 : vector<8x128xf32>
    %cst_56 = arith.constant 1.000000e+00 : f32
    %125 = vector.broadcast %cst_56 : f32 to vector<8x128xf32>
    %126 = arith.addf %125, %124 : vector<8x128xf32>
    %127 = arith.mulf %116, %126 : vector<8x128xf32>
    %128 = arith.truncf %127 : vector<8x128xf32> to vector<8x128xbf16>
    %c0_57 = arith.constant 0 : index
    %c0_58 = arith.constant 0 : index
    %c0_59 = arith.constant 0 : index
    %129 = vector.load %arg15[%c0_57, %c0_58, %c0_59] : memref<1x128x32xbf16, #tpu.memory_space<vmem>>, vector<1x128x32xbf16>
    %130 = vector.shape_cast %129 : vector<1x128x32xbf16> to vector<128x32xbf16>
    %cst_60 = arith.constant dense<0.000000e+00> : vector<8x32xf32>
    %131 = tpu.matmul %128, %130, %cst_60 {dimension_numbers = #tpu.dot_dimension_numbers<[1], [0], [0], [1], [0, 0, 1, 1], [], []>} : vector<8x128xbf16>, vector<128x32xbf16>, vector<8x32xf32> -> vector<8x32xf32>
    %132 = arith.addf %77, %131 : vector<8x32xf32>
    %c0_61 = arith.constant 0 : index
    %c0_62 = arith.constant 0 : index
    %c0_63 = arith.constant 0 : index
    %133 = vector.load %arg16[%c0_61, %c0_62, %c0_63] : memref<1x1x32xbf16, #tpu.memory_space<vmem>>, vector<1x1x32xbf16>
    %134 = vector.shape_cast %133 : vector<1x1x32xbf16> to vector<1x32xbf16>
    %135 = arith.extf %134 : vector<1x32xbf16> to vector<1x32xf32>
    %136 = vector.broadcast %135 : vector<1x32xf32> to vector<8x32xf32>
    %137 = arith.addf %132, %136 : vector<8x32xf32>
    %c0_64 = arith.constant 0 : index
    %c0_65 = arith.constant 0 : index
    %138 = vector.load %arg20[%c0_64, %c0_65] : memref<8x32xf32, #tpu.memory_space<vmem>>, vector<8x32xf32>
    tpu.vector_store %arg20[%c0_64, %c0_65], %137 {strides = array<i32>} : memref<8x32xf32, #tpu.memory_space<vmem>>, vector<8x32xf32>,
    %c2_i32 = arith.constant 2 : i32
    %139 = arith.cmpi eq, %arg1, %c2_i32 : i32
    %140 = arith.extui %139 : i1 to i32
    %c0_i32_66 = arith.constant 0 : i32
    %141 = arith.cmpi ne, %140, %c0_i32_66 : i32
    scf.if %141 {
      %c0_67 = arith.constant 0 : index
      %c0_68 = arith.constant 0 : index
      %c0_69 = arith.constant 0 : index
      %142 = vector.load %arg19[%c0_67, %c0_68, %c0_69] : memref<1x8x32xf32, #tpu.memory_space<vmem>>, vector<1x8x32xf32>
      %143 = vector.shape_cast %142 : vector<1x8x32xf32> to vector<8x32xf32>
      %144 = vector.shape_cast %137 : vector<8x32xf32> to vector<1x8x32xf32>
      tpu.vector_store %arg19[%c0_67, %c0_68, %c0_69], %144 {strides = array<i32>} : memref<1x8x32xf32, #tpu.memory_space<vmem>>, vector<1x8x32xf32>,
    } else {
    }
    return
  }
  func.func @transform_0(%arg0: i32, %arg1: i32) -> (i32, i32, i32) {
    %c0_i32 = arith.constant 0 : i32
    %c0_i32_0 = arith.constant 0 : i32
    %c0_i32_1 = arith.constant 0 : i32
    return %arg0, %c0_i32, %c0_i32_0 : i32, i32, i32
  }
  func.func @transform_1(%arg0: i32, %arg1: i32) -> (i32, i32) {
    %c0_i32 = arith.constant 0 : i32
    %c0_i32_0 = arith.constant 0 : i32
    %c0_i32_1 = arith.constant 0 : i32
    return %c0_i32, %c0_i32_0 : i32, i32
  }
  func.func @transform_2(%arg0: i32, %arg1: i32) -> (i32, i32) {
    %c0_i32 = arith.constant 0 : i32
    %c0_i32_0 = arith.constant 0 : i32
    %c0_i32_1 = arith.constant 0 : i32
    return %c0_i32, %c0_i32_0 : i32, i32
  }
  func.func @transform_3(%arg0: i32, %arg1: i32) -> (i32, i32, i32) {
    %c0_i32 = arith.constant 0 : i32
    %c0_i32_0 = arith.constant 0 : i32
    %c0_i32_1 = arith.constant 0 : i32
    return %arg1, %c0_i32, %c0_i32_0 : i32, i32, i32
  }
  func.func @transform_4(%arg0: i32, %arg1: i32) -> (i32, i32, i32) {
    %c0_i32 = arith.constant 0 : i32
    %c0_i32_0 = arith.constant 0 : i32
    %c0_i32_1 = arith.constant 0 : i32
    return %arg1, %c0_i32, %c0_i32_0 : i32, i32, i32
  }
  func.func @transform_5(%arg0: i32, %arg1: i32) -> (i32, i32, i32, i32) {
    %c0_i32 = arith.constant 0 : i32
    %c0_i32_0 = arith.constant 0 : i32
    %c0_i32_1 = arith.constant 0 : i32
    %c0_i32_2 = arith.constant 0 : i32
    return %arg1, %c0_i32, %c0_i32_0, %c0_i32_1 : i32, i32, i32, i32
  }
  func.func @transform_6(%arg0: i32, %arg1: i32) -> (i32, i32, i32, i32) {
    %c0_i32 = arith.constant 0 : i32
    %c0_i32_0 = arith.constant 0 : i32
    %c0_i32_1 = arith.constant 0 : i32
    %c0_i32_2 = arith.constant 0 : i32
    return %arg1, %c0_i32, %c0_i32_0, %c0_i32_1 : i32, i32, i32, i32
  }
  func.func @transform_7(%arg0: i32, %arg1: i32) -> (i32, i32, i32, i32) {
    %c0_i32 = arith.constant 0 : i32
    %c0_i32_0 = arith.constant 0 : i32
    %c0_i32_1 = arith.constant 0 : i32
    %c0_i32_2 = arith.constant 0 : i32
    return %arg1, %c0_i32, %c0_i32_0, %c0_i32_1 : i32, i32, i32, i32
  }
  func.func @transform_8(%arg0: i32, %arg1: i32) -> (i32, i32, i32) {
    %c0_i32 = arith.constant 0 : i32
    %c0_i32_0 = arith.constant 0 : i32
    %c0_i32_1 = arith.constant 0 : i32
    return %arg1, %c0_i32, %c0_i32_0 : i32, i32, i32
  }
  func.func @transform_9(%arg0: i32, %arg1: i32) -> (i32, i32, i32) {
    %c0_i32 = arith.constant 0 : i32
    %c0_i32_0 = arith.constant 0 : i32
    %c0_i32_1 = arith.constant 0 : i32
    return %arg1, %c0_i32, %c0_i32_0 : i32, i32, i32
  }
  func.func @transform_10(%arg0: i32, %arg1: i32) -> (i32, i32, i32) {
    %c0_i32 = arith.constant 0 : i32
    %c0_i32_0 = arith.constant 0 : i32
    %c0_i32_1 = arith.constant 0 : i32
    return %arg1, %c0_i32, %c0_i32_0 : i32, i32, i32
  }
  func.func @transform_11(%arg0: i32, %arg1: i32) -> (i32, i32, i32) {
    %c0_i32 = arith.constant 0 : i32
    %c0_i32_0 = arith.constant 0 : i32
    %c0_i32_1 = arith.constant 0 : i32
    return %arg1, %c0_i32, %c0_i32_0 : i32, i32, i32
  }
  func.func @transform_12(%arg0: i32, %arg1: i32) -> (i32, i32, i32) {
    %c0_i32 = arith.constant 0 : i32
    %c0_i32_0 = arith.constant 0 : i32
    %c0_i32_1 = arith.constant 0 : i32
    return %arg1, %c0_i32, %c0_i32_0 : i32, i32, i32
  }
  func.func @transform_13(%arg0: i32, %arg1: i32) -> (i32, i32, i32) {
    %c0_i32 = arith.constant 0 : i32
    %c0_i32_0 = arith.constant 0 : i32
    %c0_i32_1 = arith.constant 0 : i32
    return %arg1, %c0_i32, %c0_i32_0 : i32, i32, i32
  }
  func.func @transform_14(%arg0: i32, %arg1: i32) -> (i32, i32, i32) {
    %c0_i32 = arith.constant 0 : i32
    %c0_i32_0 = arith.constant 0 : i32
    %c0_i32_1 = arith.constant 0 : i32
    return %arg1, %c0_i32, %c0_i32_0 : i32, i32, i32
  }
  func.func @transform_15(%arg0: i32, %arg1: i32) -> (i32, i32) {
    %c0_i32 = arith.constant 0 : i32
    %c0_i32_0 = arith.constant 0 : i32
    %c0_i32_1 = arith.constant 0 : i32
    return %c0_i32, %c0_i32_0 : i32, i32
  }
  func.func @transform_16(%arg0: i32, %arg1: i32) -> (i32, i32) {
    %c0_i32 = arith.constant 0 : i32
    %c0_i32_0 = arith.constant 0 : i32
    %c0_i32_1 = arith.constant 0 : i32
    return %c0_i32, %c0_i32_0 : i32, i32
  }
  func.func @transform_17(%arg0: i32, %arg1: i32) -> (i32, i32, i32) {
    %c0_i32 = arith.constant 0 : i32
    %c0_i32_0 = arith.constant 0 : i32
    %c0_i32_1 = arith.constant 0 : i32
    return %arg0, %c0_i32, %c0_i32_0 : i32, i32, i32
  }
}

</mosaic_0001>

<bundles_post_ra>
// kernel: tpu_custom_call.1
= control target key start
LH: loop header
LB: loop body
LE: loop exit
PB: predicated region body
PF: predicated region fallthrough
CT: control target
= control target key end

     0   :  { %s2629_s0 = inlined_call_operand.vmem [shape: bf16[2,8,192], index: 0, kind: input, shape index: {}]   ;;  %s2630_s1 = inlined_call_operand.vmem [shape: bf16[192,32], index: 1, kind: input, shape index: {}]   ;;  %s2631_s2 = inlined_call_operand.vmem [shape: bf16[8,32], index: 2, kind: input, shape index: {}]   ;;  %s2632_s3 = inlined_call_operand.vmem [shape: bf16[3,1,32], index: 3, kind: input, shape index: {}]   ;;  %s2633_s4 = inlined_call_operand.vmem [shape: bf16[3,1,32], index: 4, kind: input, shape index: {}]   ;;  %s2634_s5 = inlined_call_operand.vmem [shape: bf16[3,4,32,24], index: 5, kind: input, shape index: {}]   ;;  %s2635_s6 = inlined_call_operand.vmem [shape: bf16[3,4,1,24], index: 6, kind: input, shape index: {}]   ;;  %s2636_s7 = inlined_call_operand.vmem [shape: bf16[3,4,8,32], index: 7, kind: input, shape index: {}]   ;;  %s2637_s8 = inlined_call_operand.vmem [shape: bf16[3,1,32], index: 8, kind: input, shape index: {}]   ;;  %s2638_s9 = inlined_call_operand.vmem [shape: bf16[3,1,32], index: 9, kind: input, shape index: {}]   ;;  %s2639_s10 = inlined_call_operand.vmem [shape: bf16[3,1,32], index: 10, kind: input, shape index: {}]   ;;  %s2640_s11 = inlined_call_operand.vmem [shape: bf16[3,32,128], index: 11, kind: input, shape index: {}]   ;;  %s2641_s12 = inlined_call_operand.vmem [shape: bf16[3,1,128], index: 12, kind: input, shape index: {}]   ;;  %s2642_s13 = inlined_call_operand.vmem [shape: bf16[3,128,32], index: 13, kind: input, shape index: {}]   ;;  %s2643_s14 = inlined_call_operand.vmem [shape: bf16[3,1,32], index: 14, kind: input, shape index: {}]   ;;  %s2644_s15 = inlined_call_operand.vmem [shape: bf16[1,32], index: 15, kind: input, shape index: {}]   ;;  %s2645_s16 = inlined_call_operand.vmem [shape: bf16[1,32], index: 16, kind: input, shape index: {}]   ;;  %s2646_s17 = inlined_call_operand.hbm [shape: f32[2,8,32], index: 17, kind: output, shape index: {}]  }
   0x1   :  { %2664 = sst [smem:[#allocation20_spill]] %s2629_s0 }
   0x2   :  { %2665 = sst [smem:[#allocation21_spill]] %s2630_s1 }
   0x3   :  { %2666 = sst [smem:[#allocation22_spill]] %s2631_s2 }
   0x4   :  { %2667 = sst [smem:[#allocation23_spill]] %s2633_s4 }
   0x5   :  { %2668 = sst [smem:[#allocation24_spill]] %s2634_s5 }
   0x6   :  { %2669 = sst [smem:[#allocation25_spill]] %s2635_s6 }
   0x7   :  { %2670 = sst [smem:[#allocation26_spill]] %s2636_s7 }
   0x8   :  { %2671 = sst [smem:[#allocation27_spill]] %s2646_s17 }
   0x9   :  { %22 = vsyncpa [#allocation4], 0 }
   0xa   :  { %24 = vsyncpa [#allocation4 + $0x1], 0  ;;  %s2260_s24 = smov 0   ;;  %s2262_s25 = smov 0  }
   0xb   :  { %s2264_s26 = smov 0   ;;  %s2266_s27 = smov 0  }
   0xc   :  { %s2268_s28 = smov 0   ;;  %s2270_s29 = smov 0  }
   0xd   :  { %s2272_s15 = smov 0   ;;  %s2274_s16 = smov 0  }
   0xe LB: > { %2672 = sst [smem:[#allocation6_spill]] %s2137_s24  ;;  %s1777_s0 = sadd.s32 4294967295, %s2165_s16   ;;  %s2165_s16 = sphi %s2274_s16, %s30_s16   ;;  %s2161_s15 = sphi %s2272_s15, %s2717_s15   ;;  %s2157_s29 = sphi %s2270_s29, %s2716_s29   ;;  %s2153_s28 = sphi %s2268_s28, %s2715_s28   ;;  %s2149_s27 = sphi %s2266_s27, %s2714_s27   ;;  %s2145_s26 = sphi %s2264_s26, %s2713_s26   ;;  %s2141_s25 = sphi %s2262_s25, %s2712_s25   ;;  %s2137_s24 = sphi %s2260_s24, %s2711_s24  }
   0xf   : > { %2673 = sst [smem:[#allocation7_spill]] %s2141_s25  ;;  %s1778_s30 = sadd.s32 4294967294, %s2165_s16  }
  0x10   : > { %2674 = sst [smem:[#allocation8_spill]] %s2145_s26  ;;  %s39_s18 = sadd.s32 1, %s2157_s29 }
  0x11   : > { %2675 = sst [smem:[#allocation9_spill]] %s2149_s27  ;;  %p40_p0 = scmp.ge.s32.totalorder %s39_s18, 3 }
  0x12   : > { %2676 = sst [smem:[#allocation10_spill]] %s2153_s28  ;;  %s42_s19 = sadd.s32 1, %s2161_s15 }
  0x13   : > { %2677 = sst [smem:[#allocation11_spill]] %s2157_s29  ;;  %p481_p1 = scmp.ne.s32.totalorder %s2145_s26, %s2141_s25 }
  0x14   : > { %2678 = sst [smem:[#allocation12_spill]] %s2161_s15  ;;  %p482_p2 = scmp.eq.s32.totalorder %s1777_s0, 5 }
  0x15   : > { %2679 = sst [smem:[#allocation13_spill]] %s2165_s16  ;;  %s2719_s18 = smov (%p40_p0, %s39_s18), 0 }
  0x16   : > { %2680 = sst [smem:[#allocation14_spill]] %s2719_s18  ;;  %s2721_s19 = smov (!%p40_p0, %s42_s19), %s2161_s15 }
  0x17   : > { %p2309_p3 = por %p482_p2, %p481_p1  ;;  %p487_p4 = scmp.ne.s32.totalorder %s2141_s25, %s2137_s24 }
  0x18   : > { %p44_p5 = scmp.ge.s32.totalorder %s2721_s19, 2  ;;  %p488_p6 = scmp.eq.s32.totalorder %s1778_s30, 5 }
  0x19   : > { %s2681_s1 = scalar_select %p2309_p3, 1, 0 }
  0x1a   : > { %p1781_p7 = scmp.ge.s32.totalorder %s2165_s16, 1  ;;  %p607_p8 = scmp.lt.s32.totalorder %s2165_s16, 7 }
  0x1b   : > { %2682 = sst [smem:[#allocation15_spill]] %s2681_s1  ;;  %s2723_s19 = smov (%p44_p5, %s2721_s19), 0 }
  0x1c   : > { %2683 = sst [smem:[#allocation16_spill]] %s2723_s19  ;;  %p2319_p9 = por %p488_p6, %p487_p4 }
  0x1d   : > { %p608_p10 = pnand %p1781_p7, %p607_p8  ;;  %s468_s21 = ssub.s32 %s2161_s15, %s2723_s19 }
  0x1e   : > { %s2684_s20 = scalar_select %p2319_p9, 1, 0 }
  0x1f   : > { %s471_s22 = sadd.s32 1, %s2145_s26  ;;  %p469_p11 = scmp.eq.s32.totalorder %s468_s21, 0 }
  0x20   : > { %2685 = sst [smem:[#allocation17_spill]] %s2684_s20  ;;  %611 = sbr.rel (%p608_p10) target bundleno = 2040 (0x7f8), region = 88 }
  0x21   : > { %s2327_s23 = scalar_select %p469_p11, %s2145_s26, %s471_s22  }
  0x23   : > { %2686 = sst [smem:[#allocation18_spill]] %s2327_s23 }
  0x25   : > { %s2651_s0 = sand.u32 1, %s2141_s25   ;;  %p704_p12 = scmp.lt.s32.totalorder %s2153_s28, 1 }
  0x26   : > { %s2333_s30 = sshll.u32 %s2651_s0, 3  ;;  %p709_p13 = scmp.lt.s32.totalorder %s2149_s27, 2 }
  0x27   : > { %s705_s18 = scalar_select %p704_p12, %s2153_s28, 1 }
  0x28   : > { %s2338_s29 = scalar_select %p709_p13, %s2149_s27, 2 }
  0x29   : > { %s1938_s21 = sshll.u32 %s705_s18, 3  ;;  %s2687_s15 = sld [smem:[#allocation20_spill]] }
  0x2a   : > { %s1939_s1 = sshll.u32 %s2338_s29, 6  ;;  %s2689_s5 = sld [smem:[#allocation24_spill]] }
  0x2b   : > { %s1787_s18 = sshll.u32 %s2338_s29, 2  ;;  %s2690_s6 = sld [smem:[#allocation25_spill]] }
  0x2c   : > { %s2691_s7 = sld [smem:[#allocation26_spill]]  ;;  %s731_s17 = scalar_lea.vmem %s2637_s8, %s2338_s29 }
  0x2d   : > { %s2393_s16 = scalar_lea.vmem %s2642_s13, %s1939_s1  ;;  %s753_s28 = scalar_lea.vmem %s2643_s14, %s2338_s29 }
  0x2e   : > { %s703_s4 = scalar_lea.vmem [#allocation3], %s2333_s30 }
  0x2f   : > { %s708_s0 = scalar_lea.vmem %s2687_s15, %s1938_s21  ;;  %s1940_s21 = sshll.u32 %s2338_s29, 4 }
  0x30   : > { %s2355_s2 = scalar_lea.vmem %s2689_s5, %s1939_s1  ;;  %s2693_s5 = sld [smem:[#allocation9_spill]] }
  0x31   : > { %s2361_s15 = scalar_lea.vmem %s2690_s6, %s1787_s18  ;;  %s2384_s6 = scalar_lea.vmem %s2640_s11, %s1940_s21 }
  0x32   : > { %s2367_s22 = scalar_lea.vmem %s2691_s7, %s1940_s21  ;;  %s745_s7 = scalar_lea.vmem %s2641_s12, %s2338_s29 }
  0x33   : > { %2692 = sst [smem:[#allocation19_spill]] %s2367_s22 }
  0x36   : > { %p1794_p0 = scmp.ne.s32.totalorder %s2693_s5, 0 }
  0x37   : > { %s2694_s19 = sld [smem:[#allocation21_spill]] (!%p1794_p0) }
  0x38   : > { %758 = sbr.rel (%p1794_p0) target bundleno = 227 (0xe3), region = 92  ;;  %s2695_s26 = sld [smem:[#allocation22_spill]] (!%p1794_p0) }
  0x3d   : > { %v1950_v0 = vld [vmem:[%s2694_s19 + $0x38] sm:$0xff]  ;;  %v1949_v2 = vld [vmem:[%s2694_s19 + $0x30] sm:$0xff]  ;;  %v1948_v4 = vld [vmem:[%s2694_s19 + $0x28] sm:$0xff]  ;;  %vm864_vm0 = vcmask 523264   ;;  %vm894_vm1 = vcmask 261120  }
  0x3e   : > { %v1954_v1 = vld [vmem:[%s2694_s19 + $0x58] sm:$0xff]  ;;  %868 = vmatpush.bf16.msra.mxu0 %v1950_v0  ;;  %v1953_v3 = vld [vmem:[%s2694_s19 + $0x50] sm:$0xff]  ;;  %v1952_v5 = vld [vmem:[%s2694_s19 + $0x48] sm:$0xff] }
  0x3f   : > { %885 = vmatpush.bf16.msra.mxu1 %v1954_v1  ;;  %v759_v6 = vld [vmem:[%s708_s0] sm:$0xff]  ;;  %v1946_v10 = vld [vmem:[%s2694_s19 + $0x18] sm:$0xff]  ;;  %v1945_v12 = vld [vmem:[%s2694_s19 + $0x10] sm:$0xff] }
  0x40   : > { %v1947_v7 = vld [vmem:[%s2694_s19 + $0x20] sm:$0xff]  ;;  %v788_v8 = vunpack.c.h.b16 %v759_v6  ;;  %v1944_v13 = vld [vmem:[%s2694_s19 + $0x8] sm:$0xff]  ;;  %v787_v14 = vunpack.c.l.b16 %v759_v6 }
  0x41   : > { %v1951_v9 = vld [vmem:[%s2694_s19 + $0x40] sm:$0xff] }
  0x42   : > { %869 = vmatpush.bf16.msra.mxu0 %v1949_v2  ;;  %v790_v11 = vpack.c.b16 %v788_v8, %v788_v8  ;;  %v1943_v15 = vld [vmem:[%s2694_s19] sm:$0xff]  ;;  %v789_v16 = vpack.c.b16 %v787_v14, %v787_v14 }
  0x43   : > { %886 = vmatpush.bf16.msra.mxu1 %v1953_v3  ;;  %v784_v19 = vld [vmem:[%s2695_s26] sm:$0xf] }
  0x44   : > { %v785_v20 = vunpack.c.l.bf16 %v784_v19 }
  0x46   : > { %870 = vmatpush.bf16.msra.mxu0 %v1948_v4 }
  0x47   : > { %887 = vmatpush.bf16.msra.mxu1 %v1952_v5 }
  0x4a   : > { %871 = vmatpush.bf16.msra.mxu0 %v1947_v7 }
  0x4b   : > { %888 = vmatpush.bf16.msra.mxu1 %v1951_v9 }
  0x4e   : > { %872 = vmatpush.bf16.msra.mxu0 %v1946_v10  ;;  %1843 = vmatmul.msk.bf16.vlgmr.msra.gmra.mxu1 %vm864_vm0, %v790_v11 }
  0x52   : > { %873 = vmatpush.bf16.msra.mxu0 %v1945_v12 }
  0x56   : > { %874 = vmatpush.bf16.msra.mxu0 %v1944_v13 }
  0x5a   : > { %875 = vmatpush.bf16.msra.mxu0 %v1943_v15 }
  0x5d   : > { %876 = vmatmul.bf16.vlgmr.msra.gmra.mxu0 %v789_v16 }
  0xcb   : > { %v890_v17 = vpop.f32.mrf.mxu1 }
  0xd3   : > { %v892_v18 = vpop.f32.mrf.mxu1 }
  0xda   : > { %v877_v21 = vpop.f32.mrf.mxu0 }
  0xdb   : > { %v878_v22 = vadd.f32 %v877_v21, %v785_v20 }
  0xdd   : > { %v891_v23 = vadd.f32 %v890_v17, %v878_v22 }
  0xdf   : > { %895 = vst.msk [vmem:[#allocation2] sm:$0xff] %vm894_vm1, %v891_v23 }
  0xe2   : > { %v879_v24 = vpop.f32.mrf.mxu0 }
  0xe3 PF: > { %vm901_vm2 = vcmask 261120   ;;  %v2167_v27 = vmov 32.0   ;;  %v1956_v39 = vld [vmem:[%s2355_s2 + $0x8] sm:$0xff]  ;;  %v1958_v40 = vld [vmem:[%s2355_s2 + $0x18] sm:$0xff]  ;;  %v1955_v42 = vld [vmem:[%s2355_s2] sm:$0xff]  ;;  %s2696_s23 = scalar_lea.vmem %s2632_s3, %s2338_s29  ;;  %s2697_s20 = sld [smem:[#allocation23_spill]] }
  0xe4   : > { %2047 = vrcp.f32 %v2167_v27  ;;  %v1962_v41 = vld [vmem:[%s2355_s2 + $0x38] sm:$0xff]  ;;  %985 = vmatpush.bf16.msra.mxu0 %v1956_v39  ;;  %1010 = vmatpush.bf16.msra.mxu2 %v1958_v40  ;;  %v1957_v43 = vld [vmem:[%s2355_s2 + $0x10] sm:$0xff]  ;;  %v1960_v46 = vld [vmem:[%s2355_s2 + $0x28] sm:$0xff]  ;;  %vm1076_vm7 = vcmask 64512   ;;  %vm1228_vm9 = vcmask 1043456   ;;  %s2699_s5 = sld [smem:[#allocation19_spill]]  ;;  %s2700_s26 = scalar_lea.vmem %s2638_s9, %s2338_s29 }
  0xe5   : > { %1060 = vmatpush.bf16.msra.mxu3 %v1962_v41  ;;  %v1961_v44 = vld [vmem:[%s2355_s2 + $0x30] sm:$0xff]  ;;  %v1959_v48 = vld [vmem:[%s2355_s2 + $0x20] sm:$0xff]  ;;  %s2168_s2 = smov 120   ;;  %s2701_s1 = scalar_lea.vmem %s2639_s10, %s2338_s29 }
  0xe6   : > { %v2440_v25 = vld [vmem:[#allocation2] sm:$0xff]  ;;  %s2702_s24 = sld [smem:[#allocation9_spill]] }
  0xe7   : > { %v902_v26 = vsel %vm901_vm2, %v2440_v25, 0.0  ;;  %v897_v53 = vld [vmem:[%s2696_s23] sm:$0x1]  ;;  %v953_v5 = vld [vmem:[%s2361_s15 + $0x1] sm:$0x1] }
  0xe8   : > { %903 = vadd.xlane.f32.xlu0 %v902_v26  ;;  %986 = vmatpush.bf16.msra.mxu0 %v1955_v42  ;;  %v898_v56 = vunpack.c.l.bf16 %v897_v53  ;;  %v952_v3 = vld [vmem:[%s2361_s15] sm:$0x1]  ;;  %v957_v7 = vunpack.c.l.bf16 %v953_v5  ;;  %v954_v20 = vld [vmem:[%s2361_s15 + $0x2] sm:$0x1]  ;;  %v955_v21 = vld [vmem:[%s2361_s15 + $0x3] sm:$0x1] }
  0xe9   : > { %1011 = vmatpush.bf16.msra.mxu2 %v1957_v43  ;;  %1061 = vmatpush.bf16.msra.mxu3 %v1961_v44  ;;  %s2698_s25 = scalar_lea.vmem %s2697_s20, %s2338_s29  ;;  %v956_v4 = vunpack.c.l.bf16 %v952_v3  ;;  %v958_v26 = vunpack.c.l.bf16 %v954_v20  ;;  %v959_v27 = vunpack.c.l.bf16 %v955_v21  ;;  %s2169_s15 = smov 112  }
  0xea   : > { %v2048_v28 = vpop.eup %2047  ;;  %v899_v55 = vld [vmem:[%s2698_s25] sm:$0x1]  ;;  %v931_v60 = vperm.slane %v898_v56, 0  ;;  %v961_v11 = vperm.slane %v957_v7, 0 }
  0xeb   : > { %v906_v29 = vmul.f32 32.0, %v2048_v28  ;;  %vm910_vm3 = vweird.f32 %v2048_v28  ;;  %v900_v58 = vunpack.c.l.bf16 %v899_v55  ;;  %v960_v6 = vperm.slane %v956_v4, 0 }
  0xec   : > { %p1933_p1 = scmp.ne.s32.totalorder %s2702_s24, 2 }
  0xed   : > { %v907_v30 = vsub.f32 1.0, %v906_v29  ;;  %1035 = vmatpush.bf16.msrb.mxu2 %v1960_v46  ;;  %v933_v63 = vperm.slane %v900_v58, 0  ;;  %v963_v29 = vperm.slane %v959_v27, 0 }
  0xef   : > { %v908_v31 = vmul.f32 %v2048_v28, %v907_v30 }
  0xf1   : > { %v909_v32 = vadd.f32 %v2048_v28, %v908_v31  ;;  %1036 = vmatpush.bf16.msrb.mxu2 %v1959_v48 }
  0xf3   : > { %v2444_v33 = vsel %vm910_vm3, %v2048_v28, %v909_v32  ;;  %v962_v28 = vperm.slane %v958_v26, 0 }
 0x15b   : > { %v904_v34 = vpop.xlane.xlu0 %903 }
 0x15c   : > { %v912_v35 = vmul.f32 %v2444_v33, %v904_v34 }
 0x15e   : > { %v913_v36 = vsub.f32 %v2440_v25, %v912_v35 }
 0x160   : > { %v914_v37 = vmul.f32 %v913_v36, %v913_v36 }
 0x162   : > { %v915_v38 = vsel %vm901_vm2, %v914_v37, 0.0 }
 0x163   : > { %916 = vadd.xlane.f32.xlu0 %v915_v38 }
 0x1d6   : > { %v917_v45 = vpop.xlane.xlu0 %916 }
 0x1d7   : > { %v918_v47 = vmul.f32 %v917_v45, %v2444_v33 }
 0x1d9   : > { %v919_v49 = vadd.f32 1e-06, %v918_v47 }
 0x1db   : > { %2049 = vrsqrt.f32 %v919_v49  ;;  %vm926_vm5 = vweird.f32 %v919_v49 }
 0x1e1   : > { %v2050_v50 = vpop.eup %2049 }
 0x1e2   : > { %v921_v51 = vmul.f32 %v2050_v50, %v919_v49  ;;  %vm927_vm4 = vweird.f32 %v2050_v50  ;;  %v1168_v49 = vlaneseq }
 0x1e3   : > { %vm928_vm6 = vmor %vm926_vm5, %vm927_vm4 }
 0x1e4   : > { %v922_v52 = vmul.f32 %v2050_v50, %v921_v51 }
 0x1e6   : > { %v923_v54 = vmul.f32 0.5, %v922_v52 }
 0x1e8   : > { %v924_v57 = vsub.f32 1.5, %v923_v54 }
 0x1ea   : > { %v925_v59 = vmul.f32 %v2050_v50, %v924_v57 }
 0x1ec   : > { %v929_v61 = vsel %vm928_vm6, %v2050_v50, %v925_v59  ;;  %v1169_v50 = vand.u32 127, %v1168_v49  ;;  %v1312_v49 = vld [vmem:[%s2699_s5] sm:$0xf] }
 0x1ed   : > { %v930_v62 = vmul.f32 %v929_v61, %v913_v36 }
 0x1ee   : > { %vm1170_vm8 = vcmp.lt.s32.totalorder %v1169_v50, 5  ;;  %v1320_v50 = vsel %vm1228_vm9, %v1312_v49, 0 }
 0x1ef   : > { %v932_v0 = vmul.f32 %v931_v60, %v930_v62 }
 0x1f1   : > { %v934_v1 = vadd.f32 %v933_v63, %v932_v0 }
 0x1f3   : > { %v935_v2 = vpack.c.bf16 %v934_v1, %v934_v1 }
 0x1f5   : > { %1852 = vmatmul.msk.bf16.vlgmr.msra.gmra.mxu0 %vm901_vm2, %v935_v2  ;;  %1861 = vmatmul.msk.bf16.vlgmr.msra.gmra.mxu2 %vm901_vm2, %v935_v2 }
 0x1f6   : > { %1879 = vmatmul.msk.bf16.vlgmr.msra.gmra.mxu3 %vm901_vm2, %v935_v2 }
 0x205   : > { %1870 = vmatmul.msk.bf16.vlgmr.msrb.gmra.mxu2 %vm901_vm2, %v935_v2 }
 0x272   : > { %v988_v8 = vpop.f32.mrf.mxu0 }
 0x273   : > { %v989_v9 = vadd.f32 %v988_v8, %v960_v6 }
 0x275   : > { %v1067_v10 = vpack.c.bf16 %v989_v9, %v989_v9 }
 0x277   : > { %v1072_v12 = vunpack.c.l.b16 %v1067_v10 }
 0x278   : > { %v1013_v13 = vpop.f32.mrf.mxu2 }
 0x279   : > { %v1014_v14 = vadd.f32 %v1013_v13, %v961_v11  ;;  %v1063_v15 = vpop.f32.mrf.mxu3  ;;  %v2474_v16 = vpack.c.b16 %v1072_v12, %v1072_v12 }
 0x27a   : > { %v990_v17 = vpop.f32.mrf.mxu0  ;;  %v1064_v32 = vadd.f32 %v1063_v15, %v963_v29 }
 0x27b   : > { %v1068_v18 = vpack.c.bf16 %v1014_v14, %v1014_v14  ;;  %1074 = vrot.lane.b32.xlu2 %v2474_v16, %s2168_s2 }
 0x27c   : > { %v1070_v36 = vpack.c.bf16 %v1064_v32, %v1064_v32 }
 0x27d   : > { %v1097_v19 = vunpack.c.l.b16 %v1068_v18 }
 0x27e   : > { %v1145_v39 = vunpack.c.l.b16 %v1070_v36 }
 0x27f   : > { %v2479_v23 = vpack.c.b16 %v1097_v19, %v1097_v19 }
 0x280   : > { %v1015_v22 = vpop.f32.mrf.mxu2  ;;  %v1146_v40 = vpack.c.b16 %v1145_v39, %v1145_v39 }
 0x281   : > { %v1065_v24 = vpop.f32.mrf.mxu3 }
 0x283   : > { %1099 = vrot.lane.b32.xlu2 %v2479_v23, %s2168_s2 }
 0x288   : > { %v1038_v30 = vpop.f32.mrf.mxu2 }
 0x289   : > { %v1039_v31 = vadd.f32 %v1038_v30, %v962_v28 }
 0x28b   : > { %v1069_v34 = vpack.c.bf16 %v1039_v31, %v1039_v31 }
 0x28d   : > { %v1121_v35 = vunpack.c.l.b16 %v1069_v34 }
 0x28f   : > { %v1122_v37 = vpack.c.b16 %v1121_v35, %v1121_v35 }
 0x290   : > { %v1040_v38 = vpop.f32.mrf.mxu2 }
 0x291   : > { %1123 = vrot.lane.b32.xlu1 %v1122_v37, %s2168_s2 }
 0x299   : > { %1147 = vrot.lane.b32.xlu1 %v1146_v40, %s2168_s2 }
 0x2d5   : > { %v1075_v41 = vpop.permute.xlu2 %1074 }
 0x2d6   : > { %v1081_v42 = vsel %vm1076_vm7, %v1075_v41, 0 }
 0x2d7   : > { %1090 = vmatpush.bf16.xpose.msrb.mxu0 %v1081_v42 }
 0x2dd   : > { %v1100_v43 = vpop.permute.xlu2 %1099 }
 0x2de   : > { %1880 = vmatmul.msk.bf16.vlgmr.msrb.gmra.mxu0 %vm1076_vm7, %v1067_v10  ;;  %v1105_v44 = vsel %vm1076_vm7, %v1100_v43, 0 }
 0x2df   : > { %1114 = vmatpush.bf16.xpose.msra.mxu1 %v1105_v44 }
 0x2e6   : > { %1881 = vmatmul.msk.bf16.vlgmr.msra.gmra.mxu1 %vm1076_vm7, %v1068_v18 }
 0x303   : > { %v1124_v45 = vpop.permute.xlu1 %1123 }
 0x304   : > { %v1129_v46 = vsel %vm1076_vm7, %v1124_v45, 0 }
 0x305   : > { %1138 = vmatpush.bf16.xpose.msra.mxu2 %v1129_v46 }
 0x30b   : > { %v1148_v47 = vpop.permute.xlu1 %1147 }
 0x30c   : > { %1882 = vmatmul.msk.bf16.vlgmr.msra.gmra.mxu2 %vm1076_vm7, %v1069_v34  ;;  %v1153_v48 = vsel %vm1076_vm7, %v1148_v47, 0 }
 0x30d   : > { %1162 = vmatpush.bf16.xpose.msrb.mxu3 %v1153_v48 }
 0x314   : > { %1883 = vmatmul.msk.bf16.vlgmr.msrb.gmra.mxu3 %vm1076_vm7, %v1070_v36 }
 0x35b   : > { %v1092_v51 = vpop.f32.mrf.mxu0 }
 0x35c   : > { %v1171_v52 = vsel %vm1170_vm8, %v1092_v51, -1e+30 }
 0x35d   : > { %v1175_v53 = vsel %vm1076_vm7, %v1171_v52, -inf }
 0x35e   : > { %1176 = vmax.xlane.f32.xlu2 %v1175_v53 }
 0x363   : > { %v1094_v54 = vpop.f32.mrf.mxu0  ;;  %v1116_v55 = vpop.f32.mrf.mxu1 }
 0x364   : > { %v1172_v56 = vsel %vm1170_vm8, %v1116_v55, -1e+30  ;;  %v1315_v54 = vld [vmem:[%s2699_s5 + $0xc] sm:$0xf] }
 0x365   : > { %v1178_v57 = vsel %vm1076_vm7, %v1172_v56, -inf  ;;  %v1377_v55 = vsel %vm1228_vm9, %v1315_v54, 0 }
 0x366   : > { %1179 = vmax.xlane.f32.xlu0 %v1178_v57 }
 0x36b   : > { %v1118_v58 = vpop.f32.mrf.mxu1 }
 0x36c   : > { %v1313_v58 = vld [vmem:[%s2699_s5 + $0x4] sm:$0xf] }
 0x38f   : > { %v1140_v59 = vpop.f32.mrf.mxu2 }
 0x390   : > { %v1173_v60 = vsel %vm1170_vm8, %v1140_v59, -1e+30  ;;  %v1339_v59 = vsel %vm1228_vm9, %v1313_v58, 0  ;;  %v1967_v58 = vld [vmem:[%s2393_s16 + $0x10] sm:$0xff] }
 0x391   : > { %v1181_v61 = vsel %vm1076_vm7, %v1173_v60, -inf }
 0x392   : > { %1182 = vmax.xlane.f32.xlu0 %v1181_v61 }
 0x397   : > { %v1142_v62 = vpop.f32.mrf.mxu2  ;;  %v1164_v63 = vpop.f32.mrf.mxu3 }
 0x398   : > { %v1174_v0 = vsel %vm1170_vm8, %v1164_v63, -1e+30 }
 0x399   : > { %v1184_v1 = vsel %vm1076_vm7, %v1174_v0, -inf }
 0x39a   : > { %1185 = vmax.xlane.f32.xlu1 %v1184_v1 }
 0x39f   : > { %v1166_v2 = vpop.f32.mrf.mxu3 }
 0x3a6   : > { %1266 = vrot.lane.b32.xlu0 %v1122_v37, %s2169_s15 }
 0x3d1   : > { %v1177_v3 = vpop.xlane.xlu2 %1176 }
 0x3d2   : > { %v1187_v4 = vsub.f32 %v1171_v52, %v1177_v3 }
 0x3d4   : > { %v1191_v5 = vmul.f32 1.442695, %v1187_v4 }
 0x3d6   : > { %2051 = vpow2.f32 %v1191_v5 }
 0x3d9   : > { %v1180_v6 = vpop.xlane.xlu0 %1179 }
 0x3da   : > { %v1188_v7 = vsub.f32 %v1172_v56, %v1180_v6  ;;  %v1314_v56 = vld [vmem:[%s2699_s5 + $0x8] sm:$0xf] }
 0x3db   : > { %v1358_v57 = vsel %vm1228_vm9, %v1314_v56, 0  ;;  %v1969_v56 = vld [vmem:[%s2393_s16 + $0x20] sm:$0xff] }
 0x3dc   : > { %v2052_v8 = vpop.eup %2051  ;;  %v1193_v9 = vmul.f32 1.442695, %v1188_v7 }
 0x3dd   : > { %v1199_v10 = vsel %vm1076_vm7, %v2052_v8, 0.0 }
 0x3de   : > { %2053 = vpow2.f32 %v1193_v9  ;;  %1200 = vadd.xlane.f32.xlu2 %v1199_v10 }
 0x3e4   : > { %v2054_v11 = vpop.eup %2053 }
 0x3e5   : > { %v1202_v12 = vsel %vm1076_vm7, %v2054_v11, 0.0 }
 0x3e6   : > { %1203 = vadd.xlane.f32.xlu1 %v1202_v12 }
 0x3f6   : > { %1287 = vrot.lane.b32.xlu2 %v1146_v40, %s2169_s15 }
 0x3ff   : > { %1223 = vrot.lane.b32.xlu1 %v2474_v16, %s2169_s15 }
 0x405   : > { %v1183_v13 = vpop.xlane.xlu0 %1182 }
 0x406   : > { %v1189_v17 = vsub.f32 %v1173_v60, %v1183_v13 }
 0x408   : > { %v1195_v19 = vmul.f32 1.442695, %v1189_v17 }
 0x40d   : > { %v1186_v14 = vpop.xlane.xlu1 %1185 }
 0x40e   : > { %v1190_v15 = vsub.f32 %v1174_v0, %v1186_v14 }
 0x410   : > { %v1197_v18 = vmul.f32 1.442695, %v1190_v15 }
 0x412   : > { %2055 = vpow2.f32 %v1197_v18 }
 0x413   : > { %2057 = vpow2.f32 %v1195_v19 }
 0x418   : > { %v2056_v20 = vpop.eup %2055  ;;  %v1267_v21 = vpop.permute.xlu0 %1266 }
 0x419   : > { %v1272_v22 = vsel %vm1228_vm9, %v1267_v21, 0  ;;  %v1208_v24 = vsel %vm1076_vm7, %v2056_v20, 0.0  ;;  %v2058_v26 = vpop.eup %2057 }
 0x41a   : > { %1209 = vadd.xlane.f32.xlu0 %v1208_v24  ;;  %1281 = vmatpush.bf16.msrb.mxu2 %v1272_v22  ;;  %v1205_v16 = vsel %vm1076_vm7, %v2058_v26, 0.0 }
 0x41e   : > { %1367 = vmatpush.bf16.msra.mxu2 %v1358_v57  ;;  %v1968_v57 = vld [vmem:[%s2393_s16 + $0x18] sm:$0xff] }
 0x422   : > { %1206 = vadd.xlane.f32.xlu0 %v1205_v16 }
 0x436   : > { %1245 = vrot.lane.b32.xlu0 %v2479_v23, %s2169_s15 }
 0x451   : > { %v1201_v27 = vpop.xlane.xlu2 %1200 }
 0x452   : > { %2059 = vrcp.f32 %v1201_v27 }
 0x458   : > { %v2060_v31 = vpop.eup %2059 }
 0x459   : > { %v1288_v28 = vpop.permute.xlu2 %1287  ;;  %v1204_v30 = vpop.xlane.xlu1 %1203  ;;  %v1215_v32 = vmul.f32 %v2060_v31, %v2052_v8  ;;  %v1399_v8 = vld [vmem:[%s731_s17] sm:$0x1] }
 0x45a   : > { %v1293_v29 = vsel %vm1228_vm9, %v1288_v28, 0 }
 0x45b   : > { %1302 = vmatpush.bf16.msra.mxu3 %v1293_v29  ;;  %v1219_v36 = vpack.c.bf16 %v1215_v32, %v1215_v32 }
 0x45f   : > { %1386 = vmatpush.bf16.msrb.mxu3 %v1377_v55  ;;  %v1970_v55 = vld [vmem:[%s2393_s16 + $0x28] sm:$0xff] }
 0x471   : > { %v1224_v34 = vpop.permute.xlu1 %1223 }
 0x472   : > { %v1230_v35 = vsel %vm1228_vm9, %v1224_v34, 0  ;;  %v1964_v34 = vld [vmem:[%s2384_s6 + $0x8] sm:$0xff] }
 0x473   : > { %1239 = vmatpush.bf16.msra.mxu0 %v1230_v35  ;;  %v1972_v35 = vld [vmem:[%s2393_s16 + $0x38] sm:$0xff] }
 0x476   : > { %1884 = vmatmul.msk.bf16.vlgmr.msra.gmra.mxu0 %vm1076_vm7, %v1219_v36 }
 0x477   : > { %1329 = vmatpush.bf16.msrb.mxu0 %v1320_v50 }
 0x47b   : > { %1463 = vmatpush.bf16.msra.mxu0 %v1964_v34 }
 0x48d   : > { %v1210_v37 = vpop.xlane.xlu0 %1209 }
 0x48e   : > { %2061 = vrcp.f32 %v1210_v37 }
 0x494   : > { %v2062_v38 = vpop.eup %2061 }
 0x495   : > { %v1218_v23 = vmul.f32 %v2062_v38, %v2056_v20  ;;  %v1207_v39 = vpop.xlane.xlu0 %1206  ;;  %v1971_v38 = vld [vmem:[%s2393_s16 + $0x30] sm:$0xff] }
 0x496   : > { %2063 = vrcp.f32 %v1207_v39 }
 0x497   : > { %v1222_v40 = vpack.c.bf16 %v1218_v23, %v1218_v23  ;;  %2065 = vrcp.f32 %v1204_v30 }
 0x499   : > { %1887 = vmatmul.msk.bf16.vlgmr.msra.gmra.mxu3 %vm1076_vm7, %v1222_v40 }
 0x49c   : > { %v2064_v41 = vpop.eup %2063 }
 0x49d   : > { %v1217_v42 = vmul.f32 %v2064_v41, %v2058_v26  ;;  %v2066_v44 = vpop.eup %2065  ;;  %v1404_v41 = vld [vmem:[%s2700_s26] sm:$0x1] }
 0x49e   : > { %v1216_v45 = vmul.f32 %v2066_v44, %v2054_v11  ;;  %v1400_v11 = vunpack.c.l.bf16 %v1399_v8  ;;  %v1406_v44 = vld [vmem:[%s2701_s1] sm:$0x1] }
 0x49f   : > { %v1221_v43 = vpack.c.bf16 %v1217_v42, %v1217_v42 }
 0x4a0   : > { %v1220_v48 = vpack.c.bf16 %v1216_v45, %v1216_v45  ;;  %v1401_v19 = vperm.slane %v1400_v11, 0 }
 0x4a1   : > { %1886 = vmatmul.msk.bf16.vlgmr.msrb.gmra.mxu2 %vm1076_vm7, %v1221_v43 }
 0x4a8   : > { %v1246_v46 = vpop.permute.xlu0 %1245 }
 0x4a9   : > { %v1251_v47 = vsel %vm1228_vm9, %v1246_v46, 0  ;;  %v1407_v46 = vunpack.c.l.bf16 %v1406_v44 }
 0x4aa   : > { %1260 = vmatpush.bf16.msrb.mxu1 %v1251_v47 }
 0x4ad   : > { %1885 = vmatmul.msk.bf16.vlgmr.msrb.gmra.mxu1 %vm1076_vm7, %v1220_v48 }
 0x4ae   : > { %1348 = vmatpush.bf16.msra.mxu1 %v1339_v59  ;;  %v1966_v59 = vld [vmem:[%s2393_s16 + $0x8] sm:$0xff] }
 0x4b2   : > { %1544 = vmatpush.bf16.msrb.mxu1 %v1972_v35 }
 0x4b6   : > { %1545 = vmatpush.bf16.msrb.mxu1 %v1971_v38 }
 0x4ba   : > { %1546 = vmatpush.bf16.msrb.mxu1 %v1970_v55 }
 0x4be   : > { %1547 = vmatpush.bf16.msrb.mxu1 %v1969_v56 }
 0x4c2   : > { %1548 = vmatpush.bf16.msrb.mxu1 %v1968_v57 }
 0x4c6   : > { %1549 = vmatpush.bf16.msrb.mxu1 %v1967_v58 }
 0x4ca   : > { %1550 = vmatpush.bf16.msrb.mxu1 %v1966_v59 }
 0x4f3   : > { %v1241_v51 = vpop.f32.mrf.mxu0 }
 0x4f4   : > { %v1308_v52 = vpack.c.bf16 %v1241_v51, %v1241_v51  ;;  %v1432_v51 = vperm.slane %v1407_v46, 0 }
 0x4f6   : > { %1888 = vmatmul.msk.bf16.vlgmr.msrb.gmra.mxu0 %vm1076_vm7, %v1308_v52 }
 0x4fb   : > { %v1243_v53 = vpop.f32.mrf.mxu0 }
 0x51c   : > { %v1304_v60 = vpop.f32.mrf.mxu3 }
 0x51d   : > { %v1311_v61 = vpack.c.bf16 %v1304_v60, %v1304_v60  ;;  %v1965_v60 = vld [vmem:[%s2393_s16] sm:$0xff] }
 0x51e   : > { %1551 = vmatpush.bf16.msrb.mxu1 %v1965_v60 }
 0x51f   : > { %1891 = vmatmul.msk.bf16.vlgmr.msrb.gmra.mxu3 %vm1076_vm7, %v1311_v61  ;;  %v1439_v61 = vld [vmem:[%s745_s7] sm:$0x1] }
 0x524   : > { %v1283_v62 = vpop.f32.mrf.mxu2  ;;  %v1306_v63 = vpop.f32.mrf.mxu3 }
 0x525   : > { %v1310_v0 = vpack.c.bf16 %v1283_v62, %v1283_v62  ;;  %v1440_v62 = vunpack.c.l.bf16 %v1439_v61 }
 0x527   : > { %1890 = vmatmul.msk.bf16.vlgmr.msra.gmra.mxu2 %vm1076_vm7, %v1310_v0  ;;  %v1441_v63 = vperm.slane %v1440_v62, 0 }
 0x52a   : > { %v1262_v1 = vpop.f32.mrf.mxu1 }
 0x52b   : > { %v1309_v2 = vpack.c.bf16 %v1262_v1, %v1262_v1 }
 0x52c   : > { %v1285_v3 = vpop.f32.mrf.mxu2 }
 0x52d   : > { %1889 = vmatmul.msk.bf16.vlgmr.msra.gmra.mxu1 %vm1076_vm7, %v1309_v2 }
 0x532   : > { %v1264_v4 = vpop.f32.mrf.mxu1 }
 0x573   : > { %v1331_v5 = vpop.f32.mrf.mxu0 }
 0x574   : > { %v1392_v12 = vsel %vm901_vm2, %v1331_v5, 0.0 }
 0x57b   : > { %v1333_v6 = vpop.f32.mrf.mxu0 }
 0x5a2   : > { %v1388_v7 = vpop.f32.mrf.mxu3 }
 0x5a3   : > { %v1397_v20 = vsel %vm901_vm2, %v1388_v7, 0.0 }
 0x5aa   : > { %v1350_v9 = vpop.f32.mrf.mxu1  ;;  %v1369_v10 = vpop.f32.mrf.mxu2 }
 0x5ab   : > { %v1393_v13 = vsel %vm901_vm2, %v1350_v9, 0.0  ;;  %v1390_v14 = vpop.f32.mrf.mxu3  ;;  %v1395_v17 = vsel %vm901_vm2, %v1369_v10, 0.0 }
 0x5ac   : > { %v1394_v15 = vadd.f32 %v1393_v13, %v1392_v12  ;;  %v1558_v13 = vld [vmem:[%s753_s28] sm:$0x1] }
 0x5ad   : > { %v1559_v14 = vunpack.c.l.bf16 %v1558_v13 }
 0x5ae   : > { %v1396_v18 = vadd.f32 %v1395_v17, %v1394_v15 }
 0x5af   : > { %v1560_v15 = vperm.slane %v1559_v14, 0 }
 0x5b0   : > { %v1398_v21 = vadd.f32 %v1397_v20, %v1396_v18 }
 0x5b2   : > { %v1402_v22 = vadd.f32 %v1401_v19, %v1398_v21  ;;  %v1352_v24 = vpop.f32.mrf.mxu1  ;;  %v1371_v26 = vpop.f32.mrf.mxu2 }
 0x5b4   : > { %v2538_v16 = vadd.f32 %v1402_v22, %v2440_v25  ;;  %v1963_v25 = vld [vmem:[%s2384_s6] sm:$0xff] }
 0x5b5   : > { %1464 = vmatpush.bf16.msra.mxu0 %v1963_v25 }
 0x5b6   : > { %v1408_v27 = vsel %vm901_vm2, %v2538_v16, 0.0 }
 0x5b7   : > { %1409 = vadd.xlane.f32.xlu0 %v1408_v27 }
 0x62a   : > { %v1410_v28 = vpop.xlane.xlu0 %1409 }
 0x62b   : > { %v1411_v29 = vmul.f32 %v1410_v28, %v2444_v33 }
 0x62d   : > { %v1412_v30 = vsub.f32 %v2538_v16, %v1411_v29 }
 0x62f   : > { %v1413_v31 = vmul.f32 %v1412_v30, %v1412_v30 }
 0x631   : > { %v1414_v32 = vsel %vm901_vm2, %v1413_v31, 0.0 }
 0x632   : > { %1415 = vadd.xlane.f32.xlu2 %v1414_v32 }
 0x6a5   : > { %v1416_v36 = vpop.xlane.xlu2 %1415 }
 0x6a6   : > { %v1417_v37 = vmul.f32 %v1416_v36, %v2444_v33  ;;  %v1405_v33 = vunpack.c.l.bf16 %v1404_v41 }
 0x6a8   : > { %v1418_v23 = vadd.f32 1e-06, %v1417_v37  ;;  %v1430_v48 = vperm.slane %v1405_v33, 0 }
 0x6aa   : > { %2067 = vrsqrt.f32 %v1418_v23  ;;  %vm1425_vm11 = vweird.f32 %v1418_v23 }
 0x6b0   : > { %v2068_v39 = vpop.eup %2067 }
 0x6b1   : > { %v1420_v40 = vmul.f32 %v2068_v39, %v1418_v23  ;;  %vm1426_vm10 = vweird.f32 %v2068_v39 }
 0x6b2   : > { %vm1427_vm12 = vmor %vm1425_vm11, %vm1426_vm10 }
 0x6b3   : > { %v1421_v42 = vmul.f32 %v2068_v39, %v1420_v40 }
 0x6b5   : > { %v1422_v43 = vmul.f32 0.5, %v1421_v42 }
 0x6b7   : > { %v1423_v45 = vsub.f32 1.5, %v1422_v43 }
 0x6b9   : > { %v1424_v47 = vmul.f32 %v2068_v39, %v1423_v45 }
 0x6bb   : > { %v1428_v49 = vsel %vm1427_vm12, %v2068_v39, %v1424_v47 }
 0x6bc   : > { %v1429_v50 = vmul.f32 %v1428_v49, %v1412_v30 }
 0x6be   : > { %v1431_v52 = vmul.f32 %v1430_v48, %v1429_v50 }
 0x6c0   : > { %v1433_v53 = vadd.f32 %v1432_v51, %v1431_v52 }
 0x6c2   : > { %v1434_v54 = vpack.c.bf16 %v1433_v53, %v1433_v53 }
 0x6c4   : > { %1900 = vmatmul.msk.bf16.vlgmr.msra.gmra.mxu0 %vm901_vm2, %v1434_v54 }
 0x741   : > { %v1466_v0 = vpop.f32.mrf.mxu0 }
 0x742   : > { %v1467_v1 = vadd.f32 %v1466_v0, %v1441_v63 }
 0x744   : > { %v1471_v2 = vmul.f32 0.044715, %v1467_v1  ;;  %v1470_v9 = vmul.f32 0.5, %v1467_v1 }
 0x746   : > { %v1472_v3 = vmul.f32 %v1471_v2, %v1467_v1 }
 0x748   : > { %v1473_v4 = vmul.f32 %v1472_v3, %v1467_v1 }
 0x749   : > { %v1468_v5 = vpop.f32.mrf.mxu0 }
 0x74a   : > { %v1474_v6 = vadd.f32 %v1473_v4, %v1467_v1 }
 0x74c   : > { %v1475_v7 = vmul.f32 0.7978846, %v1474_v6 }
 0x74e   : > { %2069 = vtanh.f32 %v1475_v7 }
 0x754   : > { %v2070_v8 = vpop.eup %2069 }
 0x755   : > { %v1477_v10 = vadd.f32 1.0, %v2070_v8 }
 0x757   : > { %v1478_v11 = vmul.f32 %v1477_v10, %v1470_v9 }
 0x759   : > { %v1479_v12 = vpack.c.bf16 %v1478_v11, %v1478_v11 }
 0x75b   : > { %1552 = vmatmul.bf16.vlgmr.msrb.gmra.mxu1 %v1479_v12 }
 0x7d8   : > { %v1553_v17 = vpop.f32.mrf.mxu1 }
 0x7d9   : > { %v1557_v18 = vadd.f32 %v1553_v17, %v2538_v16 }
 0x7db   : > { %v1561_v19 = vadd.f32 %v1560_v15, %v1557_v18 }
 0x7dc   : > { %1566 = sbr.rel (%p1933_p1) target bundleno = 2018 (0x7e2), region = 96 }
 0x7dd   : > { %1562 = vst.msk [vmem:[#allocation2] sm:$0xff] %vm901_vm2, %v1561_v19 }
 0x7e0   : > { %v1555_v20 = vpop.f32.mrf.mxu1 }
 0x7e1   : > { %1567 = vst.msk [vmem:[%s703_s4] sm:$0xff] %vm901_vm2, %v1561_v19 }
 0x7e2 PF: > { %s2703_s20 = sld [smem:[#allocation10_spill]]  ;;  %s1581_s27 = sshll.u32 %s703_s4, 4  ;;  %s1582_s27 = int_to_ptr.vmem [resolvable:$true] %s1581_s27 }
 0x7e3   : > { %s2704_s29 = sld [smem:[#allocation7_spill]] }
 0x7e4   : > { %s2706_s5 = sld [smem:[#allocation27_spill]] }
 0x7e8   : > { %s1935_s25 = sshll.u32 %s2703_s20, 3 }
 0x7e9   : > { %s2707_s21 = sand.u32 1, %s2704_s29  }
 0x7ea   : > { %s1579_s18 = scalar_lea.hbm %s2706_s5, %s1935_s25  ;;  %s1569_s26 = scalar_lea.sflag [#allocation4], %s2707_s21 }
 0x7eb   : > { %s1583_s17 = sshll.u32 %s1579_s18, 4  ;;  %s2091_s0 = scalar_lea.hbm %s2706_s5, 16  ;;  %s1584_s17 = int_to_ptr.hbm [resolvable:$true] %s1583_s17 }
 0x7ec   : > { %s2085_s6 = sshra.s32 %s1584_s17, 4  ;;  %s2086_s6 = int_to_ptr.hbm [resolvable:$true] %s2085_s6 }
 0x7ed   : > { %s2087_s22 = scalar_lea.hbm %s2086_s6, 8  ;;  %p2092_p6 = scmp.lt.s32.totalorder %s2086_s6, %s2706_s5 }
 0x7ee   : > { %p2088_p2 = scmp.ne.s32.totalorder %s2086_s6, %s2087_s22  ;;  %p2093_p7 = scmp.lt.s32.totalorder %s2091_s0, %s2087_s22 }
 0x7f0   : > { %p2089_p4 = pnand %p2088_p2, %p2309_p3  ;;  %p2094_p8 = por %p2093_p7, %p2092_p6 }
 0x7f2   : > { %p2090_p5 = pneg %p2089_p4 }
 0x7f4   : > { %p2095_p10 = pnand %p2094_p8, %p2090_p5 }
 0x7f6   : > { %2098 = shalt.err (!%p2095_p10)
}
 0x7f7   : > { %1973 = dma.vmem_to_hbm [thread:$0]  (%p2309_p3), %s1582_s27, 128, %s1584_s17, %s1569_s26  }
 0x7f8 PF: > { %s2708_s30 = sld [smem:[#allocation13_spill]] }
 0x7f9   : > { %s2709_s4 = sld [smem:[#allocation6_spill]] }
 0x7fe   : > { %p1979_p11 = scmp.ge.s32.totalorder %s2708_s30, 2 }
 0x7ff   : > { %s1595_s20 = sand.u32 1, %s2709_s4  }
 0x800   : > { %p1976_p12 = pnand %p1979_p11, %p2319_p9  ;;  %s1596_s29 = scalar_lea.sflag [#allocation4], %s1595_s20 }
 0x802   : > { %p1977_p13 = pneg %p1976_p12 }
 0x804   : > { %2132 = dma.done.wait (%p1977_p13), %s1596_s29, 128  }
 0x805   : > { %2134 = vsyncadd (%p1977_p13), %s1596_s29, 4294967168  ;;  %s30_s16 = sadd.s32 1, %s2708_s30   ;;  %s2711_s24 = sld [smem:[#allocation7_spill]] }
 0x806   : > { %p27_p0 = scmp.ge.s32.totalorder %s30_s16, 8   ;;  %s2712_s25 = sld [smem:[#allocation8_spill]] }
 0x807   : > { %s2713_s26 = sld [smem:[#allocation18_spill]] }
 0x808   : > { %s2714_s27 = sld [smem:[#allocation11_spill]]  ;;  %29 = sbr.rel (!%p27_p0) target bundleno = 14 (0xe), region = 167 }
 0x809   : > { %s2715_s28 = sld [smem:[#allocation12_spill]] }
 0x80a   : > { %s2716_s29 = sld [smem:[#allocation14_spill]] }
 0x80b   : > { %s2717_s15 = sld [smem:[#allocation16_spill]] }
 0x80d   :  { %1602 = vsyncpa [#allocation4], 1 }
 0x80e   :  { %1604 = vsyncpa [#allocation4 + $0x1], 1 }

</bundles_post_ra>
